<compile_context>
chip_gen: v5e
topology: v5e:2x2
jax: 0.10.0
libtpu: 0.0.40
codegen_flags: <defaults>
</compile_context>

<pallas_src>
import jax
import jax.numpy as jnp
from jax.experimental import pallas as pl
from jax.experimental.pallas import tpu as pltpu

_LANE = 128
_SUBLANE = 8


def _round_up(v, m):
    return (v + m - 1) // m * m


def _mlp_kernel(x_ref, w1_ref, b1_ref, w2_ref, b2_ref, o_ref):
    # Cast the streamed activation tile to the MXU operand dtype in-kernel.
    x = x_ref[...].astype(w1_ref.dtype)
    # First matmul on the MXU, f32 accumulation.
    h = jnp.dot(x, w1_ref[...], preferred_element_type=jnp.float32)
    # Bias + ReLU epilogue stays f32 (works on v5e's f32-only VPU too).
    h = jnp.maximum(h + b1_ref[...], 0.0)
    # Second matmul; cast the activation to the weight dtype for the MXU.
    o = jnp.dot(h.astype(w2_ref.dtype), w2_ref[...],
                preferred_element_type=jnp.float32)
    o_ref[...] = (o + b2_ref[...]).astype(o_ref.dtype)


def fully_connected(x, w1, b1, w2, b2, *, compute_dtype=jnp.bfloat16,
                    tile_m=None):
    """x: (B, C, H, W) or (B, input_size). Returns (B, output_size) in x.dtype.

    compute_dtype: dtype of the matmul *operands* (default bf16 -> native MXU
    path + half the weight DMA bytes); accumulation and the bias/ReLU epilogue
    are always f32, so only operand rounding is lossy vs. an f32 reference.
    """
    B = x.shape[0]
    x2d = x.reshape(B, -1)                       # == x.view(x.size(0), -1)
    in_size = x2d.shape[1]
    hidden = w1.shape[1]
    out_size = w2.shape[1]
    assert w1.shape == (in_size, hidden)
    assert b1.shape == (hidden,)
    assert w2.shape == (hidden, out_size)
    assert b2.shape == (out_size,)

    out_dtype = x2d.dtype
    compute_dtype = jnp.dtype(compute_dtype)
    x_isz = jnp.dtype(x2d.dtype).itemsize
    cd_isz = compute_dtype.itemsize
    out_isz = jnp.dtype(out_dtype).itemsize

    # ---- generation-aware VMEM policy --------------------------------------
    try:
        vmem_cap = int(pltpu.get_tpu_info().vmem_capacity_bytes)
    except Exception:
        vmem_cap = 64 << 20                      # conservative (v7x per-TC)
    big_vmem = vmem_cap >= (96 << 20)            # v5e/v6e: 128 MiB; v7x: 64 MiB
    act_budget = (72 << 20) if big_vmem else (24 << 20)
    vmem_cap_limit = (100 << 20) if big_vmem else (48 << 20)
    target_tile = 1024 if big_vmem else 512

    # ---- lane-dense padding of the small dims -------------------------------
    # >=128 keeps both matmuls and the output stores unmasked; large sub-32-bit
    # dims are rounded to 256 to match the v6e/v7x 2x256^2 MXU.
    def _pad_dim(d):
        if cd_isz <= 2 and d >= 256:
            return _round_up(d, 256)
        return _round_up(d, _LANE)

    h_pad = _pad_dim(hidden)
    n_pad = _pad_dim(out_size)

    # ---- batch tiling --------------------------------------------------------
    # Per-grid-step VMEM footprint: double-buffered x/out blocks plus the f32
    # hidden/out intermediates and the cast-to-compute_dtype copies.
    def _tile_bytes(tm):
        stream = 2 * tm * (in_size * x_isz + n_pad * out_isz)
        interm = tm * (in_size * cd_isz + h_pad * (4 + cd_isz) + n_pad * 4)
        return stream + interm

    if tile_m is None:
        tile_m = target_tile
    tile_m = min(tile_m, _round_up(B, _SUBLANE))
    tile_m = max(_SUBLANE, _round_up(tile_m, _SUBLANE))
    while tile_m > _SUBLANE and _tile_bytes(tile_m) > act_budget:
        tile_m = max(_SUBLANE, _round_up(tile_m // 2, _SUBLANE))
    if not big_vmem:
        # v7x has 2 TensorCores: make sure a moderate batch yields >=2 parallel
        # grid steps so both cores get work (no effect on 1-TC v5e/v6e).
        half = _round_up(pl.cdiv(_round_up(B, _SUBLANE), 2), _SUBLANE)
        if half >= 256 and tile_m > half:
            tile_m = half

    grid = (pl.cdiv(B, tile_m),)                 # ragged tail handled by Pallas

    # ---- resident, zero-padded weights/biases (padding is exact: the extra
    # hidden columns get bias 0 -> relu(0)=0 and W2's padded rows are 0) ------
    w1_p = jnp.zeros((in_size, h_pad), compute_dtype).at[:, :hidden].set(
        w1.astype(compute_dtype))
    b1_p = jnp.zeros((1, h_pad), jnp.float32).at[0, :hidden].set(
        b1.astype(jnp.float32))
    w2_p = jnp.zeros((h_pad, n_pad), compute_dtype).at[:hidden, :out_size].set(
        w2.astype(compute_dtype))
    b2_p = jnp.zeros((1, n_pad), jnp.float32).at[0, :out_size].set(
        b2.astype(jnp.float32))

    weight_bytes = ((in_size * h_pad + h_pad * n_pad) * cd_isz
                    + (h_pad + n_pad) * 4)
    flops = 2 * B * (in_size * h_pad + h_pad * n_pad)
    bytes_accessed = (x2d.size * x_isz
                      + (w1_p.size + w2_p.size) * cd_isz
                      + (b1_p.size + b2_p.size) * 4
                      + B * n_pad * out_isz)

    # TODO(synk): for very large in_size (resident W1 exceeding the VMEM budget,
    # ~half the threshold on v7x), add a K grid axis ("arbitrary", last) with an
    # f32 VMEM accumulator and pl.when init/finalize.

    def _call(single_buffer_weights):
        # Resident operands (constant index_map) are only DMA'd once; single-
        # buffer them so their VMEM footprint isn't doubled.
        res = ({"pipeline_mode": pl.Buffered(1)} if single_buffer_weights
               else {})
        in_specs = [
            pl.BlockSpec((tile_m, in_size), lambda i: (i, 0)),   # streamed
            pl.BlockSpec((in_size, h_pad), lambda i: (0, 0), **res),
            pl.BlockSpec((1, h_pad), lambda i: (0, 0), **res),
            pl.BlockSpec((h_pad, n_pad), lambda i: (0, 0), **res),
            pl.BlockSpec((1, n_pad), lambda i: (0, 0), **res),
        ]
        out_spec = pl.BlockSpec((tile_m, n_pad), lambda i: (i, 0))
        wbufs = 1 if single_buffer_weights else 2
        need = wbufs * weight_bytes + _tile_bytes(tile_m)
        vmem_limit = int(min(max(need * 3 // 2 + (2 << 20), 16 << 20),
                             vmem_cap_limit))
        return pl.pallas_call(
            _mlp_kernel,
            out_shape=jax.ShapeDtypeStruct((B, n_pad), out_dtype),
            grid=grid,
            in_specs=in_specs,
            out_specs=out_spec,
            compiler_params=pltpu.CompilerParams(
                dimension_semantics=("parallel",),
                vmem_limit_bytes=vmem_limit,
            ),
            cost_estimate=pl.CostEstimate(
                flops=flops, transcendentals=0,
                bytes_accessed=bytes_accessed),
        )(x2d, w1_p, b1_p, w2_p, b2_p)

    try:
        out_p = _call(True)
    except Exception:
        # pl.Buffered(1) unsupported on this jax version/config: fall back to
        # default double-buffered resident weights (correctness unchanged).
        out_p = _call(False)

    return out_p if n_pad == out_size else out_p[:, :out_size]


def init_params(key, input_size, hidden_size, output_size, dtype=jnp.float32):
    """Deterministic init mimicking nn.Linear's U(-1/sqrt(fan_in), +1/sqrt(fan_in))."""
    k1, k2, k3, k4 = jax.random.split(key, 4)
    s1 = 1.0 / jnp.sqrt(input_size)
    s2 = 1.0 / jnp.sqrt(hidden_size)
    w1 = jax.random.uniform(k1, (input_size, hidden_size), dtype, -s1, s1)
    b1 = jax.random.uniform(k2, (hidden_size,), dtype, -s1, s1)
    w2 = jax.random.uniform(k3, (hidden_size, output_size), dtype, -s2, s2)
    b2 = jax.random.uniform(k4, (output_size,), dtype, -s2, s2)
    return w1, b1, w2, b2


if __name__ == "__main__":
    # Small shapes consistent with the module: x = (2, 4, 16, 16) -> input_size = 1024
    B, C, H, W = 2, 4, 16, 16
    input_size = C * H * W
    hidden_size = 32
    output_size = 16

    key = jax.random.PRNGKey(0)
    kx, kp = jax.random.split(key)
    x = jax.random.normal(kx, (B, C, H, W), jnp.float32)
    w1, b1, w2, b2 = init_params(kp, input_size, hidden_size, output_size)

    out = fully_connected(x, w1, b1, w2, b2)       # default: bf16 operands
    jax.block_until_ready(out)
    assert out.shape == (B, output_size)

    x2d = x.reshape(B, -1)
    bf = lambda a: a.astype(jnp.bfloat16).astype(jnp.float32)

    # Reference 1: bf16-operand / f32-accumulation model of the kernel (tight).
    h_ref = jnp.maximum(bf(x2d) @ bf(w1) + b1, 0.0)
    ref_bf16 = bf(h_ref) @ bf(w2) + b2
    assert jnp.allclose(out, ref_bf16, atol=2e-3, rtol=2e-3)

    # Reference 2: pure f32 math; loose tolerance covers bf16 operand rounding.
    ref_f32 = jnp.maximum(x2d @ w1 + b1, 0.0) @ w2 + b2
    assert jnp.allclose(out, ref_f32, atol=5e-2, rtol=5e-2)

    print("KERNEL_OK")
</pallas_src>

<mosaic_0001>
module attributes {stable_mosaic.version = 11 : i64} {
  func.func @_mlp_kernel(%arg0: i32, %arg1: memref<8x1024xf32, #tpu.memory_space<vmem>>, %arg2: memref<1024x128xbf16, #tpu.memory_space<vmem>>, %arg3: memref<1x128xf32, #tpu.memory_space<vmem>>, %arg4: memref<128x128xbf16, #tpu.memory_space<vmem>>, %arg5: memref<1x128xf32, #tpu.memory_space<vmem>>, %arg6: memref<8x128xf32, #tpu.memory_space<vmem>>) attributes {dimension_semantics = [#tpu.dimension_semantics<parallel>], iteration_bounds = array<i64: 1>, scalar_prefetch = 0 : i64, scratch_operands = 0 : i64, tpu.core_type = #tpu.core_type<tc>, window_params = [{transform_indices = @transform_0, window_bounds = array<i64: 8, 1024>}, {pipeline_mode = #tpu.pipeline_mode<synchronous>, transform_indices = @transform_1, window_bounds = array<i64: 1024, 128>}, {pipeline_mode = #tpu.pipeline_mode<synchronous>, transform_indices = @transform_2, window_bounds = array<i64: 1, 128>}, {pipeline_mode = #tpu.pipeline_mode<synchronous>, transform_indices = @transform_3, window_bounds = array<i64: 128, 128>}, {pipeline_mode = #tpu.pipeline_mode<synchronous>, transform_indices = @transform_4, window_bounds = array<i64: 1, 128>}, {transform_indices = @transform_5, window_bounds = array<i64: 8, 128>}]} {
    %c0 = arith.constant 0 : index
    %c0_0 = arith.constant 0 : index
    %0 = vector.load %arg1[%c0, %c0_0] : memref<8x1024xf32, #tpu.memory_space<vmem>>, vector<8x1024xf32>
    %1 = arith.truncf %0 : vector<8x1024xf32> to vector<8x1024xbf16>
    %c0_1 = arith.constant 0 : index
    %c0_2 = arith.constant 0 : index
    %2 = vector.load %arg2[%c0_1, %c0_2] : memref<1024x128xbf16, #tpu.memory_space<vmem>>, vector<1024x128xbf16>
    %cst = arith.constant dense<0.000000e+00> : vector<8x128xf32>
    %3 = tpu.matmul %1, %2, %cst {dimension_numbers = #tpu.dot_dimension_numbers<[1], [0], [0], [1], [0, 0, 1, 1], [], []>} : vector<8x1024xbf16>, vector<1024x128xbf16>, vector<8x128xf32> -> vector<8x128xf32>
    %c0_3 = arith.constant 0 : index
    %c0_4 = arith.constant 0 : index
    %4 = vector.load %arg3[%c0_3, %c0_4] : memref<1x128xf32, #tpu.memory_space<vmem>>, vector<1x128xf32>
    %5 = vector.broadcast %4 : vector<1x128xf32> to vector<8x128xf32>
    %6 = arith.addf %3, %5 : vector<8x128xf32>
    %cst_5 = arith.constant 0.000000e+00 : f32
    %7 = vector.broadcast %cst_5 : f32 to vector<8x128xf32>
    %8 = arith.maximumf %6, %7 : vector<8x128xf32>
    %9 = arith.truncf %8 : vector<8x128xf32> to vector<8x128xbf16>
    %c0_6 = arith.constant 0 : index
    %c0_7 = arith.constant 0 : index
    %10 = vector.load %arg4[%c0_6, %c0_7] : memref<128x128xbf16, #tpu.memory_space<vmem>>, vector<128x128xbf16>
    %cst_8 = arith.constant dense<0.000000e+00> : vector<8x128xf32>
    %11 = tpu.matmul %9, %10, %cst_8 {dimension_numbers = #tpu.dot_dimension_numbers<[1], [0], [0], [1], [0, 0, 1, 1], [], []>} : vector<8x128xbf16>, vector<128x128xbf16>, vector<8x128xf32> -> vector<8x128xf32>
    %c0_9 = arith.constant 0 : index
    %c0_10 = arith.constant 0 : index
    %12 = vector.load %arg5[%c0_9, %c0_10] : memref<1x128xf32, #tpu.memory_space<vmem>>, vector<1x128xf32>
    %13 = vector.broadcast %12 : vector<1x128xf32> to vector<8x128xf32>
    %14 = arith.addf %11, %13 : vector<8x128xf32>
    %c0_11 = arith.constant 0 : index
    %c0_12 = arith.constant 0 : index
    %15 = vector.load %arg6[%c0_11, %c0_12] : memref<8x128xf32, #tpu.memory_space<vmem>>, vector<8x128xf32>
    tpu.vector_store %arg6[%c0_11, %c0_12], %14 {strides = array<i32>} : memref<8x128xf32, #tpu.memory_space<vmem>>, vector<8x128xf32>,
    return
  }
  func.func @transform_0(%arg0: i32) -> (i32, i32) {
    %c0_i32 = arith.constant 0 : i32
    %c0_i32_0 = arith.constant 0 : i32
    return %arg0, %c0_i32 : i32, i32
  }
  func.func @transform_1(%arg0: i32) -> (i32, i32) {
    %c0_i32 = arith.constant 0 : i32
    %c0_i32_0 = arith.constant 0 : i32
    %c0_i32_1 = arith.constant 0 : i32
    return %c0_i32, %c0_i32_0 : i32, i32
  }
  func.func @transform_2(%arg0: i32) -> (i32, i32) {
    %c0_i32 = arith.constant 0 : i32
    %c0_i32_0 = arith.constant 0 : i32
    %c0_i32_1 = arith.constant 0 : i32
    return %c0_i32, %c0_i32_0 : i32, i32
  }
  func.func @transform_3(%arg0: i32) -> (i32, i32) {
    %c0_i32 = arith.constant 0 : i32
    %c0_i32_0 = arith.constant 0 : i32
    %c0_i32_1 = arith.constant 0 : i32
    return %c0_i32, %c0_i32_0 : i32, i32
  }
  func.func @transform_4(%arg0: i32) -> (i32, i32) {
    %c0_i32 = arith.constant 0 : i32
    %c0_i32_0 = arith.constant 0 : i32
    %c0_i32_1 = arith.constant 0 : i32
    return %c0_i32, %c0_i32_0 : i32, i32
  }
  func.func @transform_5(%arg0: i32) -> (i32, i32) {
    %c0_i32 = arith.constant 0 : i32
    %c0_i32_0 = arith.constant 0 : i32
    return %arg0, %c0_i32 : i32, i32
  }
}

module attributes {stable_mosaic.version = 11 : i64} {
  func.func @_mlp_kernel(%arg0: i32, %arg1: memref<8x1024xf32, #tpu.memory_space<vmem>>, %arg2: memref<1024x128xbf16, #tpu.memory_space<vmem>>, %arg3: memref<1x128xf32, #tpu.memory_space<vmem>>, %arg4: memref<128x128xbf16, #tpu.memory_space<vmem>>, %arg5: memref<1x128xf32, #tpu.memory_space<vmem>>, %arg6: memref<8x128xf32, #tpu.memory_space<vmem>>) attributes {dimension_semantics = [#tpu.dimension_semantics<parallel>], iteration_bounds = array<i64: 1>, scalar_prefetch = 0 : i64, scratch_operands = 0 : i64, tpu.core_type = #tpu.core_type<tc>, window_params = [{transform_indices = @transform_0, window_bounds = array<i64: 8, 1024>}, {pipeline_mode = #tpu.pipeline_mode<synchronous>, transform_indices = @transform_1, window_bounds = array<i64: 1024, 128>}, {pipeline_mode = #tpu.pipeline_mode<synchronous>, transform_indices = @transform_2, window_bounds = array<i64: 1, 128>}, {pipeline_mode = #tpu.pipeline_mode<synchronous>, transform_indices = @transform_3, window_bounds = array<i64: 128, 128>}, {pipeline_mode = #tpu.pipeline_mode<synchronous>, transform_indices = @transform_4, window_bounds = array<i64: 1, 128>}, {transform_indices = @transform_5, window_bounds = array<i64: 8, 128>}]} {
    %c0 = arith.constant 0 : index
    %c0_0 = arith.constant 0 : index
    %0 = vector.load %arg1[%c0, %c0_0] : memref<8x1024xf32, #tpu.memory_space<vmem>>, vector<8x1024xf32>
    %1 = arith.truncf %0 : vector<8x1024xf32> to vector<8x1024xbf16>
    %c0_1 = arith.constant 0 : index
    %c0_2 = arith.constant 0 : index
    %2 = vector.load %arg2[%c0_1, %c0_2] : memref<1024x128xbf16, #tpu.memory_space<vmem>>, vector<1024x128xbf16>
    %cst = arith.constant dense<0.000000e+00> : vector<8x128xf32>
    %3 = tpu.matmul %1, %2, %cst {dimension_numbers = #tpu.dot_dimension_numbers<[1], [0], [0], [1], [0, 0, 1, 1], [], []>} : vector<8x1024xbf16>, vector<1024x128xbf16>, vector<8x128xf32> -> vector<8x128xf32>
    %c0_3 = arith.constant 0 : index
    %c0_4 = arith.constant 0 : index
    %4 = vector.load %arg3[%c0_3, %c0_4] : memref<1x128xf32, #tpu.memory_space<vmem>>, vector<1x128xf32>
    %5 = vector.broadcast %4 : vector<1x128xf32> to vector<8x128xf32>
    %6 = arith.addf %3, %5 : vector<8x128xf32>
    %cst_5 = arith.constant 0.000000e+00 : f32
    %7 = vector.broadcast %cst_5 : f32 to vector<8x128xf32>
    %8 = arith.maximumf %6, %7 : vector<8x128xf32>
    %9 = arith.truncf %8 : vector<8x128xf32> to vector<8x128xbf16>
    %c0_6 = arith.constant 0 : index
    %c0_7 = arith.constant 0 : index
    %10 = vector.load %arg4[%c0_6, %c0_7] : memref<128x128xbf16, #tpu.memory_space<vmem>>, vector<128x128xbf16>
    %cst_8 = arith.constant dense<0.000000e+00> : vector<8x128xf32>
    %11 = tpu.matmul %9, %10, %cst_8 {dimension_numbers = #tpu.dot_dimension_numbers<[1], [0], [0], [1], [0, 0, 1, 1], [], []>} : vector<8x128xbf16>, vector<128x128xbf16>, vector<8x128xf32> -> vector<8x128xf32>
    %c0_9 = arith.constant 0 : index
    %c0_10 = arith.constant 0 : index
    %12 = vector.load %arg5[%c0_9, %c0_10] : memref<1x128xf32, #tpu.memory_space<vmem>>, vector<1x128xf32>
    %13 = vector.broadcast %12 : vector<1x128xf32> to vector<8x128xf32>
    %14 = arith.addf %11, %13 : vector<8x128xf32>
    %c0_11 = arith.constant 0 : index
    %c0_12 = arith.constant 0 : index
    %15 = vector.load %arg6[%c0_11, %c0_12] : memref<8x128xf32, #tpu.memory_space<vmem>>, vector<8x128xf32>
    tpu.vector_store %arg6[%c0_11, %c0_12], %14 {strides = array<i32>} : memref<8x128xf32, #tpu.memory_space<vmem>>, vector<8x128xf32>,
    return
  }
  func.func @transform_0(%arg0: i32) -> (i32, i32) {
    %c0_i32 = arith.constant 0 : i32
    %c0_i32_0 = arith.constant 0 : i32
    return %arg0, %c0_i32 : i32, i32
  }
  func.func @transform_1(%arg0: i32) -> (i32, i32) {
    %c0_i32 = arith.constant 0 : i32
    %c0_i32_0 = arith.constant 0 : i32
    %c0_i32_1 = arith.constant 0 : i32
    return %c0_i32, %c0_i32_0 : i32, i32
  }
  func.func @transform_2(%arg0: i32) -> (i32, i32) {
    %c0_i32 = arith.constant 0 : i32
    %c0_i32_0 = arith.constant 0 : i32
    %c0_i32_1 = arith.constant 0 : i32
    return %c0_i32, %c0_i32_0 : i32, i32
  }
  func.func @transform_3(%arg0: i32) -> (i32, i32) {
    %c0_i32 = arith.constant 0 : i32
    %c0_i32_0 = arith.constant 0 : i32
    %c0_i32_1 = arith.constant 0 : i32
    return %c0_i32, %c0_i32_0 : i32, i32
  }
  func.func @transform_4(%arg0: i32) -> (i32, i32) {
    %c0_i32 = arith.constant 0 : i32
    %c0_i32_0 = arith.constant 0 : i32
    %c0_i32_1 = arith.constant 0 : i32
    return %c0_i32, %c0_i32_0 : i32, i32
  }
  func.func @transform_5(%arg0: i32) -> (i32, i32) {
    %c0_i32 = arith.constant 0 : i32
    %c0_i32_0 = arith.constant 0 : i32
    return %arg0, %c0_i32 : i32, i32
  }
}

</mosaic_0001>

<bundles_post_ra>
// kernel: tpu_custom_call.1
= control target key start
LH: loop header
LB: loop body
LE: loop exit
PB: predicated region body
PF: predicated region fallthrough
CT: control target
= control target key end

     0   :  { %10 = vsyncpa [#allocation3], 0  ;;  %s1379_s0 = inlined_call_operand.hbm [shape: f32[2,1024], index: 0, kind: input, shape index: {}]   ;;  %s1380_s1 = inlined_call_operand.hbm [shape: bf16[1024,128], index: 1, kind: input, shape index: {}]   ;;  %s1381_s2 = inlined_call_operand.vmem [shape: f32[1,128], index: 2, kind: input, shape index: {}]   ;;  %s1382_s3 = inlined_call_operand.hbm [shape: bf16[128,128], index: 3, kind: input, shape index: {}]   ;;  %s1383_s4 = inlined_call_operand.vmem [shape: f32[1,128], index: 4, kind: input, shape index: {}]   ;;  %s1384_s5 = inlined_call_operand.hbm [shape: f32[2,128], index: 5, kind: output, shape index: {}]  }
   0x1   :  { %11 = vsyncpa [#allocation6], 0 }
   0x2   :  { %12 = vsyncpa [#allocation4], 0  ;;  %s30_s20 = sshll.u32 %s1380_s1, 4  ;;  %s31_s20 = int_to_ptr.hbm [resolvable:$true] %s30_s20 }
   0x3   :  { %16 = vsyncadd [#allocation3], 768  ;;  %s1321_s21 = smov [#allocation5]   ;;  %s17_s25 = sshll.u32 %s1379_s0, 4  ;;  %s18_s25 = int_to_ptr.hbm [resolvable:$true] %s17_s25 }
   0x4   :  { %s32_s22 = sshll.u32 %s1321_s21, 4  ;;  %s1322_s26 = smov 64   ;;  %s33_s22 = int_to_ptr.vmem [resolvable:$true] %s32_s22 }
   0x5   :  { %s1323_s27 = smov 4   ;;  %s1324_s28 = smov [#allocation2]  }
   0x6   :  { %38 = dma.hbm_to_vmem [thread:$0]  %s31_s20, 8192, %s33_s22, [#allocation6], %s1322_s26, %s1322_s26, %s1323_s27  }
   0x7   :  { %s19_s29 = sshll.u32 %s1324_s28, 4  ;;  %s1325_s30 = smov 256   ;;  %s20_s29 = int_to_ptr.vmem [resolvable:$true] %s19_s29 }
   0x8   :  { %s1326_s6 = smov 16   ;;  %s45_s8 = sshll.u32 %s1382_s3, 4  ;;  %s46_s8 = int_to_ptr.hbm [resolvable:$true] %s45_s8 }
   0x9   :  { %25 = dma.hbm_to_vmem [thread:$0]  %s18_s25, 256, %s20_s29, [#allocation3], %s1325_s30, %s1325_s30, %s1326_s6  }
   0xa   :  { %s1327_s9 = smov [#allocation7]  }
   0xb   :  { %s47_s10 = sshll.u32 %s1327_s9, 4  ;;  %s48_s10 = int_to_ptr.vmem [resolvable:$true] %s47_s10 }
   0xc   :  { %53 = dma.hbm_to_vmem [thread:$0]  %s46_s8, 1024, %s48_s10, [#allocation6], %s1322_s26, %s1322_s26, %s1323_s27  }
   0xd   :  { %1315 = dma.done.wait [#allocation3], 1024  }
   0xe   :  { %1316 = vsyncadd [#allocation3], 4294966272 }
   0xf   :  { %1317 = dma.done.wait [#allocation6], 9216  }
  0x10   :  { %1318 = vsyncadd [#allocation6], 4294958080  ;;  %v1142_v0 = vld [vmem:[#allocation5 + $0x38] sm:$0xff]  ;;  %v1141_v4 = vld [vmem:[#allocation5 + $0x30] sm:$0xff] }
  0x11   :  { %v1150_v1 = vld [vmem:[#allocation5 + $0x78] sm:$0xff]  ;;  %639 = vmatpush.bf16.msra.mxu0 %v1142_v0  ;;  %v1149_v5 = vld [vmem:[#allocation5 + $0x70] sm:$0xff]  ;;  %v1140_v8 = vld [vmem:[#allocation5 + $0x28] sm:$0xff] }
  0x12   :  { %v1158_v2 = vld [vmem:[#allocation5 + $0xb8] sm:$0xff]  ;;  %652 = vmatpush.bf16.msra.mxu1 %v1150_v1  ;;  %v1157_v6 = vld [vmem:[#allocation5 + $0xb0] sm:$0xff]  ;;  %v1148_v9 = vld [vmem:[#allocation5 + $0x68] sm:$0xff] }
  0x13   :  { %v1166_v3 = vld [vmem:[#allocation5 + $0xf8] sm:$0xff]  ;;  %665 = vmatpush.bf16.msra.mxu2 %v1158_v2  ;;  %v1165_v7 = vld [vmem:[#allocation5 + $0xf0] sm:$0xff]  ;;  %v1156_v10 = vld [vmem:[#allocation5 + $0xa8] sm:$0xff] }
  0x14   :  { %678 = vmatpush.bf16.msra.mxu3 %v1166_v3  ;;  %v1164_v11 = vld [vmem:[#allocation5 + $0xe8] sm:$0xff]  ;;  %v1139_v12 = vld [vmem:[#allocation5 + $0x20] sm:$0xff]  ;;  %v1138_v16 = vld [vmem:[#allocation5 + $0x18] sm:$0xff] }
  0x15   :  { %640 = vmatpush.bf16.msra.mxu0 %v1141_v4  ;;  %v1147_v13 = vld [vmem:[#allocation5 + $0x60] sm:$0xff]  ;;  %v70_v18 = vld [vmem:[#allocation2 + $0x10] sm:$0xff]  ;;  %v1146_v19 = vld [vmem:[#allocation5 + $0x58] sm:$0xff] }
  0x16   :  { %653 = vmatpush.bf16.msra.mxu1 %v1149_v5  ;;  %v1155_v14 = vld [vmem:[#allocation5 + $0xa0] sm:$0xff]  ;;  %v74_v21 = vld [vmem:[#allocation2 + $0x30] sm:$0xff]  ;;  %v1154_v22 = vld [vmem:[#allocation5 + $0x98] sm:$0xff]  ;;  %86 = vst [vmem:[#allocation1 + $0x1] ss:$4 sm:$0xff] %v70_v18 }
  0x17   :  { %666 = vmatpush.bf16.msra.mxu2 %v1157_v6  ;;  %v1163_v15 = vld [vmem:[#allocation5 + $0xe0] sm:$0xff]  ;;  %v1162_v23 = vld [vmem:[#allocation5 + $0xd8] sm:$0xff]  ;;  %90 = vst [vmem:[#allocation1 + $0x3] ss:$4 sm:$0xff] %v74_v21  ;;  %v1137_v24 = vld [vmem:[#allocation5 + $0x10] sm:$0xff] }
  0x18   :  { %679 = vmatpush.bf16.msra.mxu3 %v1165_v7  ;;  %v68_v17 = vld [vmem:[#allocation2] sm:$0xff]  ;;  %v1145_v25 = vld [vmem:[#allocation5 + $0x50] sm:$0xff]  ;;  %v69_v28 = vld [vmem:[#allocation2 + $0x8] sm:$0xff] }
  0x19   :  { %641 = vmatpush.bf16.msra.mxu0 %v1140_v8  ;;  %v72_v20 = vld [vmem:[#allocation2 + $0x20] sm:$0xff]  ;;  %84 = vst [vmem:[#allocation1] ss:$4 sm:$0xff] %v68_v17  ;;  %v1153_v26 = vld [vmem:[#allocation5 + $0x90] sm:$0xff]  ;;  %v71_v29 = vld [vmem:[#allocation2 + $0x18] sm:$0xff] }
  0x1a   :  { %654 = vmatpush.bf16.msra.mxu1 %v1148_v9  ;;  %88 = vst [vmem:[#allocation1 + $0x2] ss:$4 sm:$0xff] %v72_v20  ;;  %v1161_v27 = vld [vmem:[#allocation5 + $0xd0] sm:$0xff]  ;;  %v1136_v30 = vld [vmem:[#allocation5 + $0x8] sm:$0xff]  ;;  %v1135_v35 = vld [vmem:[#allocation5] sm:$0xff] }
  0x1b   :  { %667 = vmatpush.bf16.msra.mxu2 %v1156_v10  ;;  %v1144_v31 = vld [vmem:[#allocation5 + $0x48] sm:$0xff]  ;;  %92 = vst [vmem:[#allocation1 + $0x20] ss:$4 sm:$0xff] %v69_v28  ;;  %v75_v36 = vld [vmem:[#allocation2 + $0x38] sm:$0xff]  ;;  %v1143_v37 = vld [vmem:[#allocation5 + $0x40] sm:$0xff] }
  0x1c   :  { %680 = vmatpush.bf16.msra.mxu3 %v1164_v11  ;;  %v1152_v32 = vld [vmem:[#allocation5 + $0x88] sm:$0xff]  ;;  %94 = vst [vmem:[#allocation1 + $0x21] ss:$4 sm:$0xff] %v71_v29  ;;  %v1151_v38 = vld [vmem:[#allocation5 + $0x80] sm:$0xff]  ;;  %v1174_v40 = vld [vmem:[#allocation5 + $0x138] sm:$0xff] }
  0x1d   :  { %642 = vmatpush.bf16.msra.mxu0 %v1139_v12  ;;  %v1160_v33 = vld [vmem:[#allocation5 + $0xc8] sm:$0xff]  ;;  %v1159_v39 = vld [vmem:[#allocation5 + $0xc0] sm:$0xff]  ;;  %v1182_v42 = vld [vmem:[#allocation5 + $0x178] sm:$0xff]  ;;  %98 = vst [vmem:[#allocation1 + $0x23] ss:$4 sm:$0xff] %v75_v36 }
  0x1e   :  { %655 = vmatpush.bf16.msra.mxu1 %v1147_v13  ;;  %v73_v34 = vld [vmem:[#allocation2 + $0x28] sm:$0xff]  ;;  %v1190_v46 = vld [vmem:[#allocation5 + $0x1b8] sm:$0xff]  ;;  %v1173_v52 = vld [vmem:[#allocation5 + $0x130] sm:$0xff] }
  0x1f   :  { %668 = vmatpush.bf16.msra.mxu2 %v1155_v14  ;;  %96 = vst [vmem:[#allocation1 + $0x22] ss:$4 sm:$0xff] %v73_v34  ;;  %v1198_v47 = vld [vmem:[#allocation5 + $0x1f8] sm:$0xff]  ;;  %v1181_v53 = vld [vmem:[#allocation5 + $0x170] sm:$0xff]  ;;  %v1172_v56 = vld [vmem:[#allocation5 + $0x128] sm:$0xff] }
  0x20   :  { %681 = vmatpush.bf16.msra.mxu3 %v1163_v15  ;;  %v1189_v54 = vld [vmem:[#allocation5 + $0x1b0] sm:$0xff]  ;;  %v1180_v57 = vld [vmem:[#allocation5 + $0x168] sm:$0xff]  ;;  %v1171_v60 = vld [vmem:[#allocation5 + $0x120] sm:$0xff] }
  0x21   :  { %643 = vmatpush.bf16.msra.mxu0 %v1138_v16  ;;  %v101_v41 = vld.sshfl [vmem:[#allocation1 + $0x10] sm:$0xff pattern:$0x73625140]  ;;  %v99_v43 = vld.sshfl [vmem:[#allocation1] sm:$0xff pattern:$0x73625140] }
  0x22   :  { %656 = vmatpush.bf16.msra.mxu1 %v1146_v19  ;;  %v102_v44 = vld.sshfl [vmem:[#allocation1 + $0x18] sm:$0xff pattern:$0x73625140]  ;;  %v100_v45 = vld.sshfl [vmem:[#allocation1 + $0x8] sm:$0xff pattern:$0x73625140]  ;;  %v117_v48 = vpack.c.bf16 %v101_v41, %v101_v41  ;;  %v115_v49 = vpack.c.bf16 %v99_v43, %v99_v43 }
  0x23   :  { %669 = vmatpush.bf16.msra.mxu2 %v1154_v22  ;;  %v118_v50 = vpack.c.bf16 %v102_v44, %v102_v44  ;;  %v116_v51 = vpack.c.bf16 %v100_v45, %v100_v45  ;;  %v1197_v55 = vld [vmem:[#allocation5 + $0x1f0] sm:$0xff]  ;;  %v1188_v58 = vld [vmem:[#allocation5 + $0x1a8] sm:$0xff]  ;;  %v1179_v61 = vld [vmem:[#allocation5 + $0x160] sm:$0xff] }
  0x24   :  { %682 = vmatpush.bf16.msra.mxu3 %v1162_v23  ;;  %v1196_v59 = vld [vmem:[#allocation5 + $0x1e8] sm:$0xff]  ;;  %v1187_v62 = vld [vmem:[#allocation5 + $0x1a0] sm:$0xff]  ;;  %v1170_v0 = vld [vmem:[#allocation5 + $0x118] sm:$0xff] }
  0x25   :  { %644 = vmatpush.bf16.msra.mxu0 %v1137_v24  ;;  %v1195_v63 = vld [vmem:[#allocation5 + $0x1e0] sm:$0xff]  ;;  %v1178_v1 = vld [vmem:[#allocation5 + $0x158] sm:$0xff]  ;;  %v1169_v4 = vld [vmem:[#allocation5 + $0x110] sm:$0xff] }
  0x26   :  { %657 = vmatpush.bf16.msra.mxu1 %v1145_v25  ;;  %v1186_v2 = vld [vmem:[#allocation5 + $0x198] sm:$0xff]  ;;  %v1177_v5 = vld [vmem:[#allocation5 + $0x150] sm:$0xff]  ;;  %v1168_v8 = vld [vmem:[#allocation5 + $0x108] sm:$0xff] }
  0x27   :  { %670 = vmatpush.bf16.msra.mxu2 %v1153_v26  ;;  %v1194_v3 = vld [vmem:[#allocation5 + $0x1d8] sm:$0xff]  ;;  %v1185_v6 = vld [vmem:[#allocation5 + $0x190] sm:$0xff]  ;;  %v1176_v9 = vld [vmem:[#allocation5 + $0x148] sm:$0xff] }
  0x28   :  { %683 = vmatpush.bf16.msra.mxu3 %v1161_v27  ;;  %v1193_v7 = vld [vmem:[#allocation5 + $0x1d0] sm:$0xff]  ;;  %v1184_v10 = vld [vmem:[#allocation5 + $0x188] sm:$0xff]  ;;  %v1167_v12 = vld [vmem:[#allocation5 + $0x100] sm:$0xff] }
  0x29   :  { %645 = vmatpush.bf16.msra.mxu0 %v1136_v30  ;;  %v1192_v11 = vld [vmem:[#allocation5 + $0x1c8] sm:$0xff]  ;;  %v1175_v13 = vld [vmem:[#allocation5 + $0x140] sm:$0xff]  ;;  %v103_v16 = vld.sshfl [vmem:[#allocation1 + $0x20] sm:$0xff pattern:$0x73625140] }
  0x2a   :  { %658 = vmatpush.bf16.msra.mxu1 %v1144_v31  ;;  %v1183_v14 = vld [vmem:[#allocation5 + $0x180] sm:$0xff]  ;;  %v105_v18 = vld.sshfl [vmem:[#allocation1 + $0x30] sm:$0xff pattern:$0x73625140]  ;;  %v119_v20 = vpack.c.bf16 %v103_v16, %v103_v16  ;;  %v1206_v24 = vld [vmem:[#allocation7 + $0x38] sm:$0xff] }
  0x2b   :  { %671 = vmatpush.bf16.msra.mxu2 %v1152_v32  ;;  %v1191_v15 = vld [vmem:[#allocation5 + $0x1c0] sm:$0xff]  ;;  %v106_v19 = vld.sshfl [vmem:[#allocation1 + $0x38] sm:$0xff pattern:$0x73625140]  ;;  %v121_v22 = vpack.c.bf16 %v105_v18, %v105_v18  ;;  %v1204_v26 = vld [vmem:[#allocation7 + $0x28] sm:$0xff] }
  0x2c   :  { %684 = vmatpush.bf16.msra.mxu3 %v1160_v33  ;;  %v104_v17 = vld.sshfl [vmem:[#allocation1 + $0x28] sm:$0xff pattern:$0x73625140]  ;;  %v122_v23 = vpack.c.bf16 %v106_v19, %v106_v19  ;;  %v1205_v25 = vld [vmem:[#allocation7 + $0x30] sm:$0xff]  ;;  %v1202_v28 = vld [vmem:[#allocation7 + $0x18] sm:$0xff] }
  0x2d   :  { %646 = vmatpush.bf16.msra.mxu0 %v1135_v35  ;;  %v120_v21 = vpack.c.bf16 %v104_v17, %v104_v17  ;;  %v1203_v27 = vld [vmem:[#allocation7 + $0x20] sm:$0xff]  ;;  %v1201_v30 = vld [vmem:[#allocation7 + $0x10] sm:$0xff]  ;;  %v1200_v32 = vld [vmem:[#allocation7 + $0x8] sm:$0xff] }
  0x2e   :  { %659 = vmatpush.bf16.msra.mxu1 %v1143_v37  ;;  %v1199_v36 = vld [vmem:[#allocation7] sm:$0xff] }
  0x2f   :  { %672 = vmatpush.bf16.msra.mxu2 %v1151_v38  ;;  %v1217_v38 = vld [vmem:[%s1381_s2] ss:$0 sm:$0xff] }
  0x30   :  { %685 = vmatpush.bf16.msra.mxu3 %v1159_v39  ;;  %647 = vmatmul.bf16.vlgmr.msra.gmra.mxu0 %v115_v49 }
  0x31   :  { %691 = vmatpush.bf16.msrb.mxu0 %v1174_v40  ;;  %660 = vmatmul.bf16.vlgmr.msra.gmra.mxu1 %v116_v51 }
  0x32   :  { %704 = vmatpush.bf16.msrb.mxu1 %v1182_v42  ;;  %673 = vmatmul.bf16.vlgmr.msra.gmra.mxu2 %v117_v48 }
  0x33   :  { %717 = vmatpush.bf16.msrb.mxu2 %v1190_v46  ;;  %686 = vmatmul.bf16.vlgmr.msra.gmra.mxu3 %v118_v50 }
  0x34   :  { %730 = vmatpush.bf16.msrb.mxu3 %v1198_v47 }
  0x35   :  { %692 = vmatpush.bf16.msrb.mxu0 %v1173_v52 }
  0x36   :  { %705 = vmatpush.bf16.msrb.mxu1 %v1181_v53 }
  0x37   :  { %718 = vmatpush.bf16.msrb.mxu2 %v1189_v54 }
  0x38   :  { %731 = vmatpush.bf16.msrb.mxu3 %v1197_v55 }
  0x39   :  { %693 = vmatpush.bf16.msrb.mxu0 %v1172_v56 }
  0x3a   :  { %706 = vmatpush.bf16.msrb.mxu1 %v1180_v57 }
  0x3b   :  { %719 = vmatpush.bf16.msrb.mxu2 %v1188_v58 }
  0x3c   :  { %732 = vmatpush.bf16.msrb.mxu3 %v1196_v59  ;;  %v1218_v59 = vld [vmem:[%s1383_s4] ss:$0 sm:$0xff] }
  0x3d   :  { %694 = vmatpush.bf16.msrb.mxu0 %v1171_v60 }
  0x3e   :  { %707 = vmatpush.bf16.msrb.mxu1 %v1179_v61 }
  0x3f   :  { %720 = vmatpush.bf16.msrb.mxu2 %v1187_v62 }
  0x40   :  { %733 = vmatpush.bf16.msrb.mxu3 %v1195_v63 }
  0x41   :  { %695 = vmatpush.bf16.msrb.mxu0 %v1170_v0 }
  0x42   :  { %708 = vmatpush.bf16.msrb.mxu1 %v1178_v1 }
  0x43   :  { %721 = vmatpush.bf16.msrb.mxu2 %v1186_v2 }
  0x44   :  { %734 = vmatpush.bf16.msrb.mxu3 %v1194_v3 }
  0x45   :  { %696 = vmatpush.bf16.msrb.mxu0 %v1169_v4 }
  0x46   :  { %709 = vmatpush.bf16.msrb.mxu1 %v1177_v5 }
  0x47   :  { %722 = vmatpush.bf16.msrb.mxu2 %v1185_v6 }
  0x48   :  { %735 = vmatpush.bf16.msrb.mxu3 %v1193_v7 }
  0x49   :  { %697 = vmatpush.bf16.msrb.mxu0 %v1168_v8 }
  0x4a   :  { %710 = vmatpush.bf16.msrb.mxu1 %v1176_v9 }
  0x4b   :  { %723 = vmatpush.bf16.msrb.mxu2 %v1184_v10 }
  0x4c   :  { %736 = vmatpush.bf16.msrb.mxu3 %v1192_v11 }
  0x4d   :  { %698 = vmatpush.bf16.msrb.mxu0 %v1167_v12 }
  0x4e   :  { %711 = vmatpush.bf16.msrb.mxu1 %v1175_v13 }
  0x4f   :  { %724 = vmatpush.bf16.msrb.mxu2 %v1183_v14 }
  0x50   :  { %737 = vmatpush.bf16.msrb.mxu3 %v1191_v15  ;;  %699 = vmatmul.bf16.vlgmr.msrb.gmra.mxu0 %v119_v20 }
  0x51   :  { %712 = vmatmul.bf16.vlgmr.msrb.gmra.mxu1 %v120_v21  ;;  %813 = vmatpush.bf16.msra.mxu0 %v1206_v24 }
  0x52   :  { %725 = vmatmul.bf16.vlgmr.msrb.gmra.mxu2 %v121_v22 }
  0x53   :  { %738 = vmatmul.bf16.vlgmr.msrb.gmra.mxu3 %v122_v23 }
  0x55   :  { %814 = vmatpush.bf16.msra.mxu0 %v1205_v25 }
  0x59   :  { %815 = vmatpush.bf16.msra.mxu0 %v1204_v26 }
  0x5d   :  { %816 = vmatpush.bf16.msra.mxu0 %v1203_v27 }
  0x61   :  { %817 = vmatpush.bf16.msra.mxu0 %v1202_v28 }
  0x65   :  { %818 = vmatpush.bf16.msra.mxu0 %v1201_v30 }
  0x69   :  { %819 = vmatpush.bf16.msra.mxu0 %v1200_v32 }
  0x6d   :  { %820 = vmatpush.bf16.msra.mxu0 %v1199_v36 }
  0xad   :  { %v648_v29 = vpop.f32.mrf.mxu0 }
  0xae   :  { %v661_v31 = vpop.f32.mrf.mxu1  ;;  %v649_v41 = vadd.f32 %v1217_v38, %v648_v29 }
  0xb0   :  { %v662_v42 = vadd.f32 %v661_v31, %v649_v41 }
  0xb5   :  { %v674_v33 = vpop.f32.mrf.mxu2  ;;  %v650_v35 = vpop.f32.mrf.mxu0 }
  0xb6   :  { %v687_v34 = vpop.f32.mrf.mxu3  ;;  %v663_v37 = vpop.f32.mrf.mxu1  ;;  %v675_v43 = vadd.f32 %v674_v33, %v662_v42 }
  0xb8   :  { %v688_v44 = vadd.f32 %v687_v34, %v675_v43 }
  0xbd   :  { %v676_v39 = vpop.f32.mrf.mxu2 }
  0xbe   :  { %v689_v40 = vpop.f32.mrf.mxu3 }
  0xcd   :  { %v700_v45 = vpop.f32.mrf.mxu0 }
  0xce   :  { %v713_v46 = vpop.f32.mrf.mxu1  ;;  %v701_v47 = vadd.f32 %v700_v45, %v688_v44 }
  0xd0   :  { %v714_v48 = vadd.f32 %v713_v46, %v701_v47 }
  0xd5   :  { %v726_v49 = vpop.f32.mrf.mxu2  ;;  %v702_v52 = vpop.f32.mrf.mxu0 }
  0xd6   :  { %v739_v50 = vpop.f32.mrf.mxu3  ;;  %v727_v51 = vadd.f32 %v726_v49, %v714_v48  ;;  %v715_v53 = vpop.f32.mrf.mxu1 }
  0xd8   :  { %v740_v54 = vadd.f32 %v739_v50, %v727_v51 }
  0xda   :  { %v743_v55 = vmax.f32 %v740_v54, 0.0 }
  0xdc   :  { %v744_v56 = vpack.c.bf16 %v743_v55, %v743_v55 }
  0xdd   :  { %v728_v57 = vpop.f32.mrf.mxu2 }
  0xde   :  { %v741_v58 = vpop.f32.mrf.mxu3  ;;  %821 = vmatmul.bf16.vlgmr.msra.gmra.mxu0 %v744_v56 }
 0x15b   :  { %v822_v60 = vpop.f32.mrf.mxu0 }
 0x15c   :  { %v823_v61 = vadd.f32 %v1218_v59, %v822_v60 }
 0x15e   :  { %826 = vst [vmem:[#allocation8] sm:$0xff] %v823_v61 }
 0x163   :  { %v824_v62 = vpop.f32.mrf.mxu0 }
 0x164   :  { %830 = vsyncadd [#allocation4], 96  ;;  %s833_s14 = sshll.u32 %s1384_s5, 4  ;;  %s1328_s15 = smov [#allocation8]   ;;  %s834_s14 = int_to_ptr.hbm [resolvable:$true] %s833_s14 }
 0x165   :  { %s831_s16 = sshll.u32 %s1328_s15, 4  ;;  %s1329_s17 = smov 32   ;;  %s832_s16 = int_to_ptr.vmem [resolvable:$true] %s831_s16 }
 0x166   :  { %s1330_s18 = smov 2  }
 0x167   :  { %839 = dma.vmem_to_hbm [thread:$0]  %s832_s16, 32, %s834_s14, [#allocation4], %s1329_s17, %s1329_s17, %s1330_s18  }
 0x168   :  { %1319 = dma.done.wait [#allocation4], 128  }
 0x169   :  { %1320 = vsyncadd [#allocation4], 4294967168 }
 0x16a   :  { %844 = vsyncpa [#allocation3], 1 }
 0x16b   :  { %845 = vsyncpa [#allocation6], 1 }
 0x16c   :  { %846 = vsyncpa [#allocation4], 1 }

// kernel: tpu_custom_call.1
= control target key start
LH: loop header
LB: loop body
LE: loop exit
PB: predicated region body
PF: predicated region fallthrough
CT: control target
= control target key end

     0   :  { %10 = vsyncpa [#allocation3], 0  ;;  %s1379_s0 = inlined_call_operand.hbm [shape: f32[2,1024], index: 0, kind: input, shape index: {}]   ;;  %s1380_s1 = inlined_call_operand.hbm [shape: bf16[1024,128], index: 1, kind: input, shape index: {}]   ;;  %s1381_s2 = inlined_call_operand.vmem [shape: f32[1,128], index: 2, kind: input, shape index: {}]   ;;  %s1382_s3 = inlined_call_operand.hbm [shape: bf16[128,128], index: 3, kind: input, shape index: {}]   ;;  %s1383_s4 = inlined_call_operand.vmem [shape: f32[1,128], index: 4, kind: input, shape index: {}]   ;;  %s1384_s5 = inlined_call_operand.hbm [shape: f32[2,128], index: 5, kind: output, shape index: {}]  }
   0x1   :  { %11 = vsyncpa [#allocation6], 0 }
   0x2   :  { %12 = vsyncpa [#allocation4], 0  ;;  %s30_s20 = sshll.u32 %s1380_s1, 4  ;;  %s31_s20 = int_to_ptr.hbm [resolvable:$true] %s30_s20 }
   0x3   :  { %16 = vsyncadd [#allocation3], 768  ;;  %s1321_s21 = smov [#allocation5]   ;;  %s17_s25 = sshll.u32 %s1379_s0, 4  ;;  %s18_s25 = int_to_ptr.hbm [resolvable:$true] %s17_s25 }
   0x4   :  { %s32_s22 = sshll.u32 %s1321_s21, 4  ;;  %s1322_s26 = smov 64   ;;  %s33_s22 = int_to_ptr.vmem [resolvable:$true] %s32_s22 }
   0x5   :  { %s1323_s27 = smov 4   ;;  %s1324_s28 = smov [#allocation2]  }
   0x6   :  { %38 = dma.hbm_to_vmem [thread:$0]  %s31_s20, 8192, %s33_s22, [#allocation6], %s1322_s26, %s1322_s26, %s1323_s27  }
   0x7   :  { %s19_s29 = sshll.u32 %s1324_s28, 4  ;;  %s1325_s30 = smov 256   ;;  %s20_s29 = int_to_ptr.vmem [resolvable:$true] %s19_s29 }
   0x8   :  { %s1326_s6 = smov 16   ;;  %s45_s8 = sshll.u32 %s1382_s3, 4  ;;  %s46_s8 = int_to_ptr.hbm [resolvable:$true] %s45_s8 }
   0x9   :  { %25 = dma.hbm_to_vmem [thread:$0]  %s18_s25, 256, %s20_s29, [#allocation3], %s1325_s30, %s1325_s30, %s1326_s6  }
   0xa   :  { %s1327_s9 = smov [#allocation7]  }
   0xb   :  { %s47_s10 = sshll.u32 %s1327_s9, 4  ;;  %s48_s10 = int_to_ptr.vmem [resolvable:$true] %s47_s10 }
   0xc   :  { %53 = dma.hbm_to_vmem [thread:$0]  %s46_s8, 1024, %s48_s10, [#allocation6], %s1322_s26, %s1322_s26, %s1323_s27  }
   0xd   :  { %1315 = dma.done.wait [#allocation3], 1024  }
   0xe   :  { %1316 = vsyncadd [#allocation3], 4294966272 }
   0xf   :  { %1317 = dma.done.wait [#allocation6], 9216  }
  0x10   :  { %1318 = vsyncadd [#allocation6], 4294958080  ;;  %v1142_v0 = vld [vmem:[#allocation5 + $0x38] sm:$0xff]  ;;  %v1141_v4 = vld [vmem:[#allocation5 + $0x30] sm:$0xff] }
  0x11   :  { %v1150_v1 = vld [vmem:[#allocation5 + $0x78] sm:$0xff]  ;;  %639 = vmatpush.bf16.msra.mxu0 %v1142_v0  ;;  %v1149_v5 = vld [vmem:[#allocation5 + $0x70] sm:$0xff]  ;;  %v1140_v8 = vld [vmem:[#allocation5 + $0x28] sm:$0xff] }
  0x12   :  { %v1158_v2 = vld [vmem:[#allocation5 + $0xb8] sm:$0xff]  ;;  %652 = vmatpush.bf16.msra.mxu1 %v1150_v1  ;;  %v1157_v6 = vld [vmem:[#allocation5 + $0xb0] sm:$0xff]  ;;  %v1148_v9 = vld [vmem:[#allocation5 + $0x68] sm:$0xff] }
  0x13   :  { %v1166_v3 = vld [vmem:[#allocation5 + $0xf8] sm:$0xff]  ;;  %665 = vmatpush.bf16.msra.mxu2 %v1158_v2  ;;  %v1165_v7 = vld [vmem:[#allocation5 + $0xf0] sm:$0xff]  ;;  %v1156_v10 = vld [vmem:[#allocation5 + $0xa8] sm:$0xff] }
  0x14   :  { %678 = vmatpush.bf16.msra.mxu3 %v1166_v3  ;;  %v1164_v11 = vld [vmem:[#allocation5 + $0xe8] sm:$0xff]  ;;  %v1139_v12 = vld [vmem:[#allocation5 + $0x20] sm:$0xff]  ;;  %v1138_v16 = vld [vmem:[#allocation5 + $0x18] sm:$0xff] }
  0x15   :  { %640 = vmatpush.bf16.msra.mxu0 %v1141_v4  ;;  %v1147_v13 = vld [vmem:[#allocation5 + $0x60] sm:$0xff]  ;;  %v70_v18 = vld [vmem:[#allocation2 + $0x10] sm:$0xff]  ;;  %v1146_v19 = vld [vmem:[#allocation5 + $0x58] sm:$0xff] }
  0x16   :  { %653 = vmatpush.bf16.msra.mxu1 %v1149_v5  ;;  %v1155_v14 = vld [vmem:[#allocation5 + $0xa0] sm:$0xff]  ;;  %v74_v21 = vld [vmem:[#allocation2 + $0x30] sm:$0xff]  ;;  %v1154_v22 = vld [vmem:[#allocation5 + $0x98] sm:$0xff]  ;;  %86 = vst [vmem:[#allocation1 + $0x1] ss:$4 sm:$0xff] %v70_v18 }
  0x17   :  { %666 = vmatpush.bf16.msra.mxu2 %v1157_v6  ;;  %v1163_v15 = vld [vmem:[#allocation5 + $0xe0] sm:$0xff]  ;;  %v1162_v23 = vld [vmem:[#allocation5 + $0xd8] sm:$0xff]  ;;  %90 = vst [vmem:[#allocation1 + $0x3] ss:$4 sm:$0xff] %v74_v21  ;;  %v1137_v24 = vld [vmem:[#allocation5 + $0x10] sm:$0xff] }
  0x18   :  { %679 = vmatpush.bf16.msra.mxu3 %v1165_v7  ;;  %v68_v17 = vld [vmem:[#allocation2] sm:$0xff]  ;;  %v1145_v25 = vld [vmem:[#allocation5 + $0x50] sm:$0xff]  ;;  %v69_v28 = vld [vmem:[#allocation2 + $0x8] sm:$0xff] }
  0x19   :  { %641 = vmatpush.bf16.msra.mxu0 %v1140_v8  ;;  %v72_v20 = vld [vmem:[#allocation2 + $0x20] sm:$0xff]  ;;  %84 = vst [vmem:[#allocation1] ss:$4 sm:$0xff] %v68_v17  ;;  %v1153_v26 = vld [vmem:[#allocation5 + $0x90] sm:$0xff]  ;;  %v71_v29 = vld [vmem:[#allocation2 + $0x18] sm:$0xff] }
  0x1a   :  { %654 = vmatpush.bf16.msra.mxu1 %v1148_v9  ;;  %88 = vst [vmem:[#allocation1 + $0x2] ss:$4 sm:$0xff] %v72_v20  ;;  %v1161_v27 = vld [vmem:[#allocation5 + $0xd0] sm:$0xff]  ;;  %v1136_v30 = vld [vmem:[#allocation5 + $0x8] sm:$0xff]  ;;  %v1135_v35 = vld [vmem:[#allocation5] sm:$0xff] }
  0x1b   :  { %667 = vmatpush.bf16.msra.mxu2 %v1156_v10  ;;  %v1144_v31 = vld [vmem:[#allocation5 + $0x48] sm:$0xff]  ;;  %92 = vst [vmem:[#allocation1 + $0x20] ss:$4 sm:$0xff] %v69_v28  ;;  %v75_v36 = vld [vmem:[#allocation2 + $0x38] sm:$0xff]  ;;  %v1143_v37 = vld [vmem:[#allocation5 + $0x40] sm:$0xff] }
  0x1c   :  { %680 = vmatpush.bf16.msra.mxu3 %v1164_v11  ;;  %v1152_v32 = vld [vmem:[#allocation5 + $0x88] sm:$0xff]  ;;  %94 = vst [vmem:[#allocation1 + $0x21] ss:$4 sm:$0xff] %v71_v29  ;;  %v1151_v38 = vld [vmem:[#allocation5 + $0x80] sm:$0xff]  ;;  %v1174_v40 = vld [vmem:[#allocation5 + $0x138] sm:$0xff] }
  0x1d   :  { %642 = vmatpush.bf16.msra.mxu0 %v1139_v12  ;;  %v1160_v33 = vld [vmem:[#allocation5 + $0xc8] sm:$0xff]  ;;  %v1159_v39 = vld [vmem:[#allocation5 + $0xc0] sm:$0xff]  ;;  %v1182_v42 = vld [vmem:[#allocation5 + $0x178] sm:$0xff]  ;;  %98 = vst [vmem:[#allocation1 + $0x23] ss:$4 sm:$0xff] %v75_v36 }
  0x1e   :  { %655 = vmatpush.bf16.msra.mxu1 %v1147_v13  ;;  %v73_v34 = vld [vmem:[#allocation2 + $0x28] sm:$0xff]  ;;  %v1190_v46 = vld [vmem:[#allocation5 + $0x1b8] sm:$0xff]  ;;  %v1173_v52 = vld [vmem:[#allocation5 + $0x130] sm:$0xff] }
  0x1f   :  { %668 = vmatpush.bf16.msra.mxu2 %v1155_v14  ;;  %96 = vst [vmem:[#allocation1 + $0x22] ss:$4 sm:$0xff] %v73_v34  ;;  %v1198_v47 = vld [vmem:[#allocation5 + $0x1f8] sm:$0xff]  ;;  %v1181_v53 = vld [vmem:[#allocation5 + $0x170] sm:$0xff]  ;;  %v1172_v56 = vld [vmem:[#allocation5 + $0x128] sm:$0xff] }
  0x20   :  { %681 = vmatpush.bf16.msra.mxu3 %v1163_v15  ;;  %v1189_v54 = vld [vmem:[#allocation5 + $0x1b0] sm:$0xff]  ;;  %v1180_v57 = vld [vmem:[#allocation5 + $0x168] sm:$0xff]  ;;  %v1171_v60 = vld [vmem:[#allocation5 + $0x120] sm:$0xff] }
  0x21   :  { %643 = vmatpush.bf16.msra.mxu0 %v1138_v16  ;;  %v101_v41 = vld.sshfl [vmem:[#allocation1 + $0x10] sm:$0xff pattern:$0x73625140]  ;;  %v99_v43 = vld.sshfl [vmem:[#allocation1] sm:$0xff pattern:$0x73625140] }
  0x22   :  { %656 = vmatpush.bf16.msra.mxu1 %v1146_v19  ;;  %v102_v44 = vld.sshfl [vmem:[#allocation1 + $0x18] sm:$0xff pattern:$0x73625140]  ;;  %v100_v45 = vld.sshfl [vmem:[#allocation1 + $0x8] sm:$0xff pattern:$0x73625140]  ;;  %v117_v48 = vpack.c.bf16 %v101_v41, %v101_v41  ;;  %v115_v49 = vpack.c.bf16 %v99_v43, %v99_v43 }
  0x23   :  { %669 = vmatpush.bf16.msra.mxu2 %v1154_v22  ;;  %v118_v50 = vpack.c.bf16 %v102_v44, %v102_v44  ;;  %v116_v51 = vpack.c.bf16 %v100_v45, %v100_v45  ;;  %v1197_v55 = vld [vmem:[#allocation5 + $0x1f0] sm:$0xff]  ;;  %v1188_v58 = vld [vmem:[#allocation5 + $0x1a8] sm:$0xff]  ;;  %v1179_v61 = vld [vmem:[#allocation5 + $0x160] sm:$0xff] }
  0x24   :  { %682 = vmatpush.bf16.msra.mxu3 %v1162_v23  ;;  %v1196_v59 = vld [vmem:[#allocation5 + $0x1e8] sm:$0xff]  ;;  %v1187_v62 = vld [vmem:[#allocation5 + $0x1a0] sm:$0xff]  ;;  %v1170_v0 = vld [vmem:[#allocation5 + $0x118] sm:$0xff] }
  0x25   :  { %644 = vmatpush.bf16.msra.mxu0 %v1137_v24  ;;  %v1195_v63 = vld [vmem:[#allocation5 + $0x1e0] sm:$0xff]  ;;  %v1178_v1 = vld [vmem:[#allocation5 + $0x158] sm:$0xff]  ;;  %v1169_v4 = vld [vmem:[#allocation5 + $0x110] sm:$0xff] }
  0x26   :  { %657 = vmatpush.bf16.msra.mxu1 %v1145_v25  ;;  %v1186_v2 = vld [vmem:[#allocation5 + $0x198] sm:$0xff]  ;;  %v1177_v5 = vld [vmem:[#allocation5 + $0x150] sm:$0xff]  ;;  %v1168_v8 = vld [vmem:[#allocation5 + $0x108] sm:$0xff] }
  0x27   :  { %670 = vmatpush.bf16.msra.mxu2 %v1153_v26  ;;  %v1194_v3 = vld [vmem:[#allocation5 + $0x1d8] sm:$0xff]  ;;  %v1185_v6 = vld [vmem:[#allocation5 + $0x190] sm:$0xff]  ;;  %v1176_v9 = vld [vmem:[#allocation5 + $0x148] sm:$0xff] }
  0x28   :  { %683 = vmatpush.bf16.msra.mxu3 %v1161_v27  ;;  %v1193_v7 = vld [vmem:[#allocation5 + $0x1d0] sm:$0xff]  ;;  %v1184_v10 = vld [vmem:[#allocation5 + $0x188] sm:$0xff]  ;;  %v1167_v12 = vld [vmem:[#allocation5 + $0x100] sm:$0xff] }
  0x29   :  { %645 = vmatpush.bf16.msra.mxu0 %v1136_v30  ;;  %v1192_v11 = vld [vmem:[#allocation5 + $0x1c8] sm:$0xff]  ;;  %v1175_v13 = vld [vmem:[#allocation5 + $0x140] sm:$0xff]  ;;  %v103_v16 = vld.sshfl [vmem:[#allocation1 + $0x20] sm:$0xff pattern:$0x73625140] }
  0x2a   :  { %658 = vmatpush.bf16.msra.mxu1 %v1144_v31  ;;  %v1183_v14 = vld [vmem:[#allocation5 + $0x180] sm:$0xff]  ;;  %v105_v18 = vld.sshfl [vmem:[#allocation1 + $0x30] sm:$0xff pattern:$0x73625140]  ;;  %v119_v20 = vpack.c.bf16 %v103_v16, %v103_v16  ;;  %v1206_v24 = vld [vmem:[#allocation7 + $0x38] sm:$0xff] }
  0x2b   :  { %671 = vmatpush.bf16.msra.mxu2 %v1152_v32  ;;  %v1191_v15 = vld [vmem:[#allocation5 + $0x1c0] sm:$0xff]  ;;  %v106_v19 = vld.sshfl [vmem:[#allocation1 + $0x38] sm:$0xff pattern:$0x73625140]  ;;  %v121_v22 = vpack.c.bf16 %v105_v18, %v105_v18  ;;  %v1204_v26 = vld [vmem:[#allocation7 + $0x28] sm:$0xff] }
  0x2c   :  { %684 = vmatpush.bf16.msra.mxu3 %v1160_v33  ;;  %v104_v17 = vld.sshfl [vmem:[#allocation1 + $0x28] sm:$0xff pattern:$0x73625140]  ;;  %v122_v23 = vpack.c.bf16 %v106_v19, %v106_v19  ;;  %v1205_v25 = vld [vmem:[#allocation7 + $0x30] sm:$0xff]  ;;  %v1202_v28 = vld [vmem:[#allocation7 + $0x18] sm:$0xff] }
  0x2d   :  { %646 = vmatpush.bf16.msra.mxu0 %v1135_v35  ;;  %v120_v21 = vpack.c.bf16 %v104_v17, %v104_v17  ;;  %v1203_v27 = vld [vmem:[#allocation7 + $0x20] sm:$0xff]  ;;  %v1201_v30 = vld [vmem:[#allocation7 + $0x10] sm:$0xff]  ;;  %v1200_v32 = vld [vmem:[#allocation7 + $0x8] sm:$0xff] }
  0x2e   :  { %659 = vmatpush.bf16.msra.mxu1 %v1143_v37  ;;  %v1199_v36 = vld [vmem:[#allocation7] sm:$0xff] }
  0x2f   :  { %672 = vmatpush.bf16.msra.mxu2 %v1151_v38  ;;  %v1217_v38 = vld [vmem:[%s1381_s2] ss:$0 sm:$0xff] }
  0x30   :  { %685 = vmatpush.bf16.msra.mxu3 %v1159_v39  ;;  %647 = vmatmul.bf16.vlgmr.msra.gmra.mxu0 %v115_v49 }
  0x31   :  { %691 = vmatpush.bf16.msrb.mxu0 %v1174_v40  ;;  %660 = vmatmul.bf16.vlgmr.msra.gmra.mxu1 %v116_v51 }
  0x32   :  { %704 = vmatpush.bf16.msrb.mxu1 %v1182_v42  ;;  %673 = vmatmul.bf16.vlgmr.msra.gmra.mxu2 %v117_v48 }
  0x33   :  { %717 = vmatpush.bf16.msrb.mxu2 %v1190_v46  ;;  %686 = vmatmul.bf16.vlgmr.msra.gmra.mxu3 %v118_v50 }
  0x34   :  { %730 = vmatpush.bf16.msrb.mxu3 %v1198_v47 }
  0x35   :  { %692 = vmatpush.bf16.msrb.mxu0 %v1173_v52 }
  0x36   :  { %705 = vmatpush.bf16.msrb.mxu1 %v1181_v53 }
  0x37   :  { %718 = vmatpush.bf16.msrb.mxu2 %v1189_v54 }
  0x38   :  { %731 = vmatpush.bf16.msrb.mxu3 %v1197_v55 }
  0x39   :  { %693 = vmatpush.bf16.msrb.mxu0 %v1172_v56 }
  0x3a   :  { %706 = vmatpush.bf16.msrb.mxu1 %v1180_v57 }
  0x3b   :  { %719 = vmatpush.bf16.msrb.mxu2 %v1188_v58 }
  0x3c   :  { %732 = vmatpush.bf16.msrb.mxu3 %v1196_v59  ;;  %v1218_v59 = vld [vmem:[%s1383_s4] ss:$0 sm:$0xff] }
  0x3d   :  { %694 = vmatpush.bf16.msrb.mxu0 %v1171_v60 }
  0x3e   :  { %707 = vmatpush.bf16.msrb.mxu1 %v1179_v61 }
  0x3f   :  { %720 = vmatpush.bf16.msrb.mxu2 %v1187_v62 }
  0x40   :  { %733 = vmatpush.bf16.msrb.mxu3 %v1195_v63 }
  0x41   :  { %695 = vmatpush.bf16.msrb.mxu0 %v1170_v0 }
  0x42   :  { %708 = vmatpush.bf16.msrb.mxu1 %v1178_v1 }
  0x43   :  { %721 = vmatpush.bf16.msrb.mxu2 %v1186_v2 }
  0x44   :  { %734 = vmatpush.bf16.msrb.mxu3 %v1194_v3 }
  0x45   :  { %696 = vmatpush.bf16.msrb.mxu0 %v1169_v4 }
  0x46   :  { %709 = vmatpush.bf16.msrb.mxu1 %v1177_v5 }
  0x47   :  { %722 = vmatpush.bf16.msrb.mxu2 %v1185_v6 }
  0x48   :  { %735 = vmatpush.bf16.msrb.mxu3 %v1193_v7 }
  0x49   :  { %697 = vmatpush.bf16.msrb.mxu0 %v1168_v8 }
  0x4a   :  { %710 = vmatpush.bf16.msrb.mxu1 %v1176_v9 }
  0x4b   :  { %723 = vmatpush.bf16.msrb.mxu2 %v1184_v10 }
  0x4c   :  { %736 = vmatpush.bf16.msrb.mxu3 %v1192_v11 }
  0x4d   :  { %698 = vmatpush.bf16.msrb.mxu0 %v1167_v12 }
  0x4e   :  { %711 = vmatpush.bf16.msrb.mxu1 %v1175_v13 }
  0x4f   :  { %724 = vmatpush.bf16.msrb.mxu2 %v1183_v14 }
  0x50   :  { %737 = vmatpush.bf16.msrb.mxu3 %v1191_v15  ;;  %699 = vmatmul.bf16.vlgmr.msrb.gmra.mxu0 %v119_v20 }
  0x51   :  { %712 = vmatmul.bf16.vlgmr.msrb.gmra.mxu1 %v120_v21  ;;  %813 = vmatpush.bf16.msra.mxu0 %v1206_v24 }
  0x52   :  { %725 = vmatmul.bf16.vlgmr.msrb.gmra.mxu2 %v121_v22 }
  0x53   :  { %738 = vmatmul.bf16.vlgmr.msrb.gmra.mxu3 %v122_v23 }
  0x55   :  { %814 = vmatpush.bf16.msra.mxu0 %v1205_v25 }
  0x59   :  { %815 = vmatpush.bf16.msra.mxu0 %v1204_v26 }
  0x5d   :  { %816 = vmatpush.bf16.msra.mxu0 %v1203_v27 }
  0x61   :  { %817 = vmatpush.bf16.msra.mxu0 %v1202_v28 }
  0x65   :  { %818 = vmatpush.bf16.msra.mxu0 %v1201_v30 }
  0x69   :  { %819 = vmatpush.bf16.msra.mxu0 %v1200_v32 }
  0x6d   :  { %820 = vmatpush.bf16.msra.mxu0 %v1199_v36 }
  0xad   :  { %v648_v29 = vpop.f32.mrf.mxu0 }
  0xae   :  { %v661_v31 = vpop.f32.mrf.mxu1  ;;  %v649_v41 = vadd.f32 %v1217_v38, %v648_v29 }
  0xb0   :  { %v662_v42 = vadd.f32 %v661_v31, %v649_v41 }
  0xb5   :  { %v674_v33 = vpop.f32.mrf.mxu2  ;;  %v650_v35 = vpop.f32.mrf.mxu0 }
  0xb6   :  { %v687_v34 = vpop.f32.mrf.mxu3  ;;  %v663_v37 = vpop.f32.mrf.mxu1  ;;  %v675_v43 = vadd.f32 %v674_v33, %v662_v42 }
  0xb8   :  { %v688_v44 = vadd.f32 %v687_v34, %v675_v43 }
  0xbd   :  { %v676_v39 = vpop.f32.mrf.mxu2 }
  0xbe   :  { %v689_v40 = vpop.f32.mrf.mxu3 }
  0xcd   :  { %v700_v45 = vpop.f32.mrf.mxu0 }
  0xce   :  { %v713_v46 = vpop.f32.mrf.mxu1  ;;  %v701_v47 = vadd.f32 %v700_v45, %v688_v44 }
  0xd0   :  { %v714_v48 = vadd.f32 %v713_v46, %v701_v47 }
  0xd5   :  { %v726_v49 = vpop.f32.mrf.mxu2  ;;  %v702_v52 = vpop.f32.mrf.mxu0 }
  0xd6   :  { %v739_v50 = vpop.f32.mrf.mxu3  ;;  %v727_v51 = vadd.f32 %v726_v49, %v714_v48  ;;  %v715_v53 = vpop.f32.mrf.mxu1 }
  0xd8   :  { %v740_v54 = vadd.f32 %v739_v50, %v727_v51 }
  0xda   :  { %v743_v55 = vmax.f32 %v740_v54, 0.0 }
  0xdc   :  { %v744_v56 = vpack.c.bf16 %v743_v55, %v743_v55 }
  0xdd   :  { %v728_v57 = vpop.f32.mrf.mxu2 }
  0xde   :  { %v741_v58 = vpop.f32.mrf.mxu3  ;;  %821 = vmatmul.bf16.vlgmr.msra.gmra.mxu0 %v744_v56 }
 0x15b   :  { %v822_v60 = vpop.f32.mrf.mxu0 }
 0x15c   :  { %v823_v61 = vadd.f32 %v1218_v59, %v822_v60 }
 0x15e   :  { %826 = vst [vmem:[#allocation8] sm:$0xff] %v823_v61 }
 0x163   :  { %v824_v62 = vpop.f32.mrf.mxu0 }
 0x164   :  { %830 = vsyncadd [#allocation4], 96  ;;  %s833_s14 = sshll.u32 %s1384_s5, 4  ;;  %s1328_s15 = smov [#allocation8]   ;;  %s834_s14 = int_to_ptr.hbm [resolvable:$true] %s833_s14 }
 0x165   :  { %s831_s16 = sshll.u32 %s1328_s15, 4  ;;  %s1329_s17 = smov 32   ;;  %s832_s16 = int_to_ptr.vmem [resolvable:$true] %s831_s16 }
 0x166   :  { %s1330_s18 = smov 2  }
 0x167   :  { %839 = dma.vmem_to_hbm [thread:$0]  %s832_s16, 32, %s834_s14, [#allocation4], %s1329_s17, %s1329_s17, %s1330_s18  }
 0x168   :  { %1319 = dma.done.wait [#allocation4], 128  }
 0x169   :  { %1320 = vsyncadd [#allocation4], 4294967168 }
 0x16a   :  { %844 = vsyncpa [#allocation3], 1 }
 0x16b   :  { %845 = vsyncpa [#allocation6], 1 }
 0x16c   :  { %846 = vsyncpa [#allocation4], 1 }

</bundles_post_ra>
